<compile_context>
chip_gen: v6e
topology: v6e:2x2x1
jax: 0.10.0
libtpu: 0.0.40
codegen_flags: <defaults>
</compile_context>

<pallas_src>
import functools

import jax
import jax.numpy as jnp
from jax.experimental import pallas as pl
from jax.experimental.pallas import tpu as pltpu

LANE = 128
SUBLANE = 8
HIDDEN = 256
TM_TARGET = 1024     # batch-tile target (512-1024+ reaches ~85%+ of roofline)
SPLIT_MIN_B = 512    # batches above this get >=2 (even) grid steps (v7x: 2 TCs)


def _round_up(x, m):
    return ((x + m - 1) // m) * m


def _cdiv(a, b):
    return -(-a // b)


def _choose_tiling(batch):
    """Pick (tm, padded_batch) minimizing tail padding; >=2 even steps for big B."""
    n = _cdiv(batch, TM_TARGET)
    if batch > SPLIT_MIN_B:
        n = max(n, 2)          # keep both v7x TensorCores busy
        if n % 2:
            n += 1             # even step count splits evenly across 2 TCs
    tm = _round_up(_cdiv(batch, n), SUBLANE)
    return tm, n * tm


# ----------------------------------------------------------------------------
# Pallas kernel: fused 4-layer MLP on one tm-row tile of the batch.
# Layer-1 input concat is replaced by three partial dots (one per concat piece).
# ----------------------------------------------------------------------------
def _netg_mlp_kernel(oh_ref, in_ref, nz_ref,
                     w1a_ref, w1b_ref, w1c_ref, b1_ref,
                     w2_ref, b2_ref, w3_ref, b3_ref, w4_ref, b4_ref, o_ref):
    bf16 = jnp.bfloat16
    # linear_1 (x @ W1 as 3 partial dots over [one_hot | input | noise]) + Tanh
    h = jnp.dot(oh_ref[...].astype(bf16), w1a_ref[...],
                preferred_element_type=jnp.float32)
    h += jnp.dot(in_ref[...].astype(bf16), w1b_ref[...],
                 preferred_element_type=jnp.float32)
    h += jnp.dot(nz_ref[...].astype(bf16), w1c_ref[...],
                 preferred_element_type=jnp.float32)
    h = jnp.tanh(h + b1_ref[...]).astype(bf16)          # bf16 between layers
    # linear_2 + LeakyReLU(0.2)  (max(h, 0.2h) == leaky_relu for slope < 1)
    h = jnp.dot(h, w2_ref[...], preferred_element_type=jnp.float32) + b2_ref[...]
    h = jnp.maximum(h, 0.2 * h).astype(bf16)
    # linear_3 (no activation)
    h = (jnp.dot(h, w3_ref[...], preferred_element_type=jnp.float32)
         + b3_ref[...]).astype(bf16)
    # linear_4 (no activation)
    o = jnp.dot(h, w4_ref[...], preferred_element_type=jnp.float32) + b4_ref[...]
    o_ref[...] = o.astype(o_ref.dtype)


def fused_mlp(one_hot, inp, noise, w1a, w1b, w1c, b1, w2, b2, w3, b3, w4, b4, tm):
    """All row inputs are (Mp, width) f32 with Mp % tm == 0. Weights bf16,
    biases f32 (1, N); W4/b4 lane-padded. Returns (Mp, Np) f32."""
    mp = one_hot.shape[0]
    np_pad = w4.shape[1]

    def row_spec(arr):       # batch-tiled activation input
        return pl.BlockSpec((tm, arr.shape[1]), lambda i: (i, 0))

    def resident(arr):       # VMEM-resident weight/bias (same block every step)
        return pl.BlockSpec(arr.shape, lambda i: (0, 0))

    return pl.pallas_call(
        _netg_mlp_kernel,
        out_shape=jax.ShapeDtypeStruct((mp, np_pad), jnp.float32),
        grid=(mp // tm,),
        in_specs=[
            row_spec(one_hot), row_spec(inp), row_spec(noise),
            resident(w1a), resident(w1b), resident(w1c), resident(b1),
            resident(w2), resident(b2),
            resident(w3), resident(b3),
            resident(w4), resident(b4),
        ],
        out_specs=pl.BlockSpec((tm, np_pad), lambda i: (i, 0)),
        compiler_params=pltpu.CompilerParams(
            dimension_semantics=("parallel",),
            # Keep large-tm tiles portable on v5e (16 MiB default scoped VMEM)
            # while staying under v7x's 64 MiB physical VMEM.
            vmem_limit_bytes=48 * 1024 * 1024,
        ),
    )(one_hot, inp, noise, w1a, w1b, w1c, b1, w2, b2, w3, b3, w4, b4)


# ----------------------------------------------------------------------------
# Parameter init (synthetic, deterministic -- not a checkpoint load).
# Weights stored as (in_features, out_features) == transpose of torch Linear.weight.
# ----------------------------------------------------------------------------
def init_params(input_dim, nz, nclasses, out_dim, key):
    k_in = nz + input_dim + nclasses
    dims = [("w1", (k_in, HIDDEN)), ("b1", (HIDDEN,)),
            ("w2", (HIDDEN, HIDDEN)), ("b2", (HIDDEN,)),
            ("w3", (HIDDEN, HIDDEN)), ("b3", (HIDDEN,)),
            ("w4", (HIDDEN, out_dim)), ("b4", (out_dim,))]
    params = {}
    for idx, (name, shp) in enumerate(dims):
        fan_in = shp[0] if name.startswith("w") else dims[idx - 1][1][0]
        bound = 1.0 / float(fan_in) ** 0.5            # torch Linear default init
        k = jax.random.fold_in(key, idx)
        params[name] = jax.random.uniform(k, shp, jnp.float32, -bound, bound)
    return params


# ----------------------------------------------------------------------------
# One-time prepack (hoisted out of the per-call forward): bf16 cast, split W1
# into the three concat pieces, lane-pad W4/b4. Call once, reuse for every step.
# ----------------------------------------------------------------------------
def prepack_params(params, *, input_dim, nz, nclasses):
    del nz  # W1 rows after nclasses+input_dim are the noise slab
    out_dim = params["b4"].shape[0]
    np_pad = _round_up(out_dim, LANE)
    w1 = params["w1"].astype(jnp.bfloat16)
    return {
        "w1_oh": w1[:nclasses],
        "w1_in": w1[nclasses:nclasses + input_dim],
        "w1_nz": w1[nclasses + input_dim:],
        "b1": params["b1"].reshape(1, HIDDEN).astype(jnp.float32),
        "w2": params["w2"].astype(jnp.bfloat16),
        "b2": params["b2"].reshape(1, HIDDEN).astype(jnp.float32),
        "w3": params["w3"].astype(jnp.bfloat16),
        "b3": params["b3"].reshape(1, HIDDEN).astype(jnp.float32),
        "w4": jnp.zeros((HIDDEN, np_pad), jnp.bfloat16).at[:, :out_dim].set(
            params["w4"].astype(jnp.bfloat16)),
        "b4": jnp.zeros((1, np_pad), jnp.float32).at[0, :out_dim].set(
            params["b4"].astype(jnp.float32)),
    }


# ----------------------------------------------------------------------------
# Forward pass (mirrors _netG.forward)
# ----------------------------------------------------------------------------
def netg_forward(packed, inp, one_hot, key, *, input_dim, nz, out_dim, r=None):
    B = inp.shape[0]                                   # batchSize
    inp = inp.reshape(-1, input_dim).astype(jnp.float32)
    one_hot = one_hot.astype(jnp.float32)

    if r is None:
        noise = jax.random.normal(key, (B, nz), jnp.float32)
    else:
        input_mean = jnp.mean(jnp.abs(inp))
        noise = jax.random.normal(key, (B, nz), jnp.float32) * (r * input_mean)

    tm, mp = _choose_tiling(B)
    if mp != B:                                        # tiny row-tail padding only
        pad = ((0, mp - B), (0, 0))
        one_hot = jnp.pad(one_hot, pad)
        inp = jnp.pad(inp, pad)
        noise = jnp.pad(noise, pad)

    y = fused_mlp(one_hot, inp, noise,
                  packed["w1_oh"], packed["w1_in"], packed["w1_nz"], packed["b1"],
                  packed["w2"], packed["b2"], packed["w3"], packed["b3"],
                  packed["w4"], packed["b4"], tm)
    return y[:B, :out_dim].reshape(-1, out_dim)


if __name__ == "__main__":
    # Small shapes consistent with the module.
    B, INPUT_DIM, NZ, NCLASSES, OUT_DIM = 8, 32, 16, 10, 64

    key = jax.random.PRNGKey(0)
    k_x, k_lab, k_p, k_noise = jax.random.split(key, 4)

    x = jax.random.normal(k_x, (B, INPUT_DIM), jnp.float32)
    labels = jax.random.randint(k_lab, (B,), 0, NCLASSES)
    one_hot = jax.nn.one_hot(labels, NCLASSES, dtype=jnp.float32)

    params = init_params(INPUT_DIM, NZ, NCLASSES, OUT_DIM, k_p)
    packed = prepack_params(params, input_dim=INPUT_DIM, nz=NZ, nclasses=NCLASSES)

    fwd = jax.jit(functools.partial(
        netg_forward, input_dim=INPUT_DIM, nz=NZ, out_dim=OUT_DIM))
    out = jax.block_until_ready(fwd(packed, x, one_hot, k_noise))

    assert out.shape == (B, OUT_DIM), out.shape
    assert out.dtype == jnp.float32
    assert bool(jnp.all(jnp.isfinite(out)))

    # Loose-tolerance check vs. plain-JAX f32 math (kernel uses bf16 MXU inputs).
    noise = jax.random.normal(k_noise, (B, NZ), jnp.float32)
    xc = jnp.concatenate([one_hot, x, noise], axis=1)
    h = jnp.tanh(xc @ params["w1"] + params["b1"])
    h = jax.nn.leaky_relu(h @ params["w2"] + params["b2"], 0.2)
    h = h @ params["w3"] + params["b3"]
    ref = h @ params["w4"] + params["b4"]
    rel_err = float(jnp.max(jnp.abs(out - ref)) / (jnp.max(jnp.abs(ref)) + 1e-6))
    assert rel_err < 1e-1, rel_err

    print("KERNEL_OK")
</pallas_src>

<mosaic_0001>
module attributes {stable_mosaic.version = 11 : i64} {
  func.func @_netg_mlp_kernel(%arg0: i32, %arg1: memref<8x10xf32, #tpu.memory_space<vmem>>, %arg2: memref<8x32xf32, #tpu.memory_space<vmem>>, %arg3: memref<8x16xf32, #tpu.memory_space<vmem>>, %arg4: memref<10x256xbf16, #tpu.memory_space<vmem>>, %arg5: memref<32x256xbf16, #tpu.memory_space<vmem>>, %arg6: memref<16x256xbf16, #tpu.memory_space<vmem>>, %arg7: memref<1x256xf32, #tpu.memory_space<vmem>>, %arg8: memref<256x256xbf16, #tpu.memory_space<vmem>>, %arg9: memref<1x256xf32, #tpu.memory_space<vmem>>, %arg10: memref<256x256xbf16, #tpu.memory_space<vmem>>, %arg11: memref<1x256xf32, #tpu.memory_space<vmem>>, %arg12: memref<256x128xbf16, #tpu.memory_space<vmem>>, %arg13: memref<1x128xf32, #tpu.memory_space<vmem>>, %arg14: memref<8x128xf32, #tpu.memory_space<vmem>>) attributes {dimension_semantics = [#tpu.dimension_semantics<parallel>], iteration_bounds = array<i64: 1>, scalar_prefetch = 0 : i64, scratch_operands = 0 : i64, tpu.core_type = #tpu.core_type<tc>, window_params = [{transform_indices = @transform_0, window_bounds = array<i64: 8, 10>}, {transform_indices = @transform_1, window_bounds = array<i64: 8, 32>}, {transform_indices = @transform_2, window_bounds = array<i64: 8, 16>}, {pipeline_mode = #tpu.pipeline_mode<synchronous>, transform_indices = @transform_3, window_bounds = array<i64: 10, 256>}, {pipeline_mode = #tpu.pipeline_mode<synchronous>, transform_indices = @transform_4, window_bounds = array<i64: 32, 256>}, {pipeline_mode = #tpu.pipeline_mode<synchronous>, transform_indices = @transform_5, window_bounds = array<i64: 16, 256>}, {pipeline_mode = #tpu.pipeline_mode<synchronous>, transform_indices = @transform_6, window_bounds = array<i64: 1, 256>}, {pipeline_mode = #tpu.pipeline_mode<synchronous>, transform_indices = @transform_7, window_bounds = array<i64: 256, 256>}, {pipeline_mode = #tpu.pipeline_mode<synchronous>, transform_indices = @transform_8, window_bounds = array<i64: 1, 256>}, {pipeline_mode = #tpu.pipeline_mode<synchronous>, transform_indices = @transform_9, window_bounds = array<i64: 256, 256>}, {pipeline_mode = #tpu.pipeline_mode<synchronous>, transform_indices = @transform_10, window_bounds = array<i64: 1, 256>}, {pipeline_mode = #tpu.pipeline_mode<synchronous>, transform_indices = @transform_11, window_bounds = array<i64: 256, 128>}, {pipeline_mode = #tpu.pipeline_mode<synchronous>, transform_indices = @transform_12, window_bounds = array<i64: 1, 128>}, {transform_indices = @transform_13, window_bounds = array<i64: 8, 128>}]} {
    %c0 = arith.constant 0 : index
    %c0_0 = arith.constant 0 : index
    %0 = vector.load %arg1[%c0, %c0_0] : memref<8x10xf32, #tpu.memory_space<vmem>>, vector<8x10xf32>
    %1 = arith.truncf %0 : vector<8x10xf32> to vector<8x10xbf16>
    %c0_1 = arith.constant 0 : index
    %c0_2 = arith.constant 0 : index
    %2 = vector.load %arg4[%c0_1, %c0_2] : memref<10x256xbf16, #tpu.memory_space<vmem>>, vector<10x256xbf16>
    %cst = arith.constant dense<0.000000e+00> : vector<8x256xf32>
    %3 = tpu.matmul %1, %2, %cst {dimension_numbers = #tpu.dot_dimension_numbers<[1], [0], [0], [1], [0, 0, 1, 1], [], []>} : vector<8x10xbf16>, vector<10x256xbf16>, vector<8x256xf32> -> vector<8x256xf32>
    %c0_3 = arith.constant 0 : index
    %c0_4 = arith.constant 0 : index
    %4 = vector.load %arg2[%c0_3, %c0_4] : memref<8x32xf32, #tpu.memory_space<vmem>>, vector<8x32xf32>
    %5 = arith.truncf %4 : vector<8x32xf32> to vector<8x32xbf16>
    %c0_5 = arith.constant 0 : index
    %c0_6 = arith.constant 0 : index
    %6 = vector.load %arg5[%c0_5, %c0_6] : memref<32x256xbf16, #tpu.memory_space<vmem>>, vector<32x256xbf16>
    %cst_7 = arith.constant dense<0.000000e+00> : vector<8x256xf32>
    %7 = tpu.matmul %5, %6, %cst_7 {dimension_numbers = #tpu.dot_dimension_numbers<[1], [0], [0], [1], [0, 0, 1, 1], [], []>} : vector<8x32xbf16>, vector<32x256xbf16>, vector<8x256xf32> -> vector<8x256xf32>
    %8 = arith.addf %3, %7 : vector<8x256xf32>
    %c0_8 = arith.constant 0 : index
    %c0_9 = arith.constant 0 : index
    %9 = vector.load %arg3[%c0_8, %c0_9] : memref<8x16xf32, #tpu.memory_space<vmem>>, vector<8x16xf32>
    %10 = arith.truncf %9 : vector<8x16xf32> to vector<8x16xbf16>
    %c0_10 = arith.constant 0 : index
    %c0_11 = arith.constant 0 : index
    %11 = vector.load %arg6[%c0_10, %c0_11] : memref<16x256xbf16, #tpu.memory_space<vmem>>, vector<16x256xbf16>
    %cst_12 = arith.constant dense<0.000000e+00> : vector<8x256xf32>
    %12 = tpu.matmul %10, %11, %cst_12 {dimension_numbers = #tpu.dot_dimension_numbers<[1], [0], [0], [1], [0, 0, 1, 1], [], []>} : vector<8x16xbf16>, vector<16x256xbf16>, vector<8x256xf32> -> vector<8x256xf32>
    %13 = arith.addf %8, %12 : vector<8x256xf32>
    %c0_13 = arith.constant 0 : index
    %c0_14 = arith.constant 0 : index
    %14 = vector.load %arg7[%c0_13, %c0_14] : memref<1x256xf32, #tpu.memory_space<vmem>>, vector<1x256xf32>
    %15 = vector.broadcast %14 : vector<1x256xf32> to vector<8x256xf32>
    %16 = arith.addf %13, %15 : vector<8x256xf32>
    %17 = math.tanh %16 : vector<8x256xf32>
    %18 = arith.truncf %17 : vector<8x256xf32> to vector<8x256xbf16>
    %c0_15 = arith.constant 0 : index
    %c0_16 = arith.constant 0 : index
    %19 = vector.load %arg8[%c0_15, %c0_16] : memref<256x256xbf16, #tpu.memory_space<vmem>>, vector<256x256xbf16>
    %cst_17 = arith.constant dense<0.000000e+00> : vector<8x256xf32>
    %20 = tpu.matmul %18, %19, %cst_17 {dimension_numbers = #tpu.dot_dimension_numbers<[1], [0], [0], [1], [0, 0, 1, 1], [], []>} : vector<8x256xbf16>, vector<256x256xbf16>, vector<8x256xf32> -> vector<8x256xf32>
    %c0_18 = arith.constant 0 : index
    %c0_19 = arith.constant 0 : index
    %21 = vector.load %arg9[%c0_18, %c0_19] : memref<1x256xf32, #tpu.memory_space<vmem>>, vector<1x256xf32>
    %22 = vector.broadcast %21 : vector<1x256xf32> to vector<8x256xf32>
    %23 = arith.addf %20, %22 : vector<8x256xf32>
    %cst_20 = arith.constant 2.000000e-01 : f32
    %24 = vector.broadcast %cst_20 : f32 to vector<8x256xf32>
    %25 = arith.mulf %24, %23 : vector<8x256xf32>
    %26 = arith.maximumf %23, %25 : vector<8x256xf32>
    %27 = arith.truncf %26 : vector<8x256xf32> to vector<8x256xbf16>
    %c0_21 = arith.constant 0 : index
    %c0_22 = arith.constant 0 : index
    %28 = vector.load %arg10[%c0_21, %c0_22] : memref<256x256xbf16, #tpu.memory_space<vmem>>, vector<256x256xbf16>
    %cst_23 = arith.constant dense<0.000000e+00> : vector<8x256xf32>
    %29 = tpu.matmul %27, %28, %cst_23 {dimension_numbers = #tpu.dot_dimension_numbers<[1], [0], [0], [1], [0, 0, 1, 1], [], []>} : vector<8x256xbf16>, vector<256x256xbf16>, vector<8x256xf32> -> vector<8x256xf32>
    %c0_24 = arith.constant 0 : index
    %c0_25 = arith.constant 0 : index
    %30 = vector.load %arg11[%c0_24, %c0_25] : memref<1x256xf32, #tpu.memory_space<vmem>>, vector<1x256xf32>
    %31 = vector.broadcast %30 : vector<1x256xf32> to vector<8x256xf32>
    %32 = arith.addf %29, %31 : vector<8x256xf32>
    %33 = arith.truncf %32 : vector<8x256xf32> to vector<8x256xbf16>
    %c0_26 = arith.constant 0 : index
    %c0_27 = arith.constant 0 : index
    %34 = vector.load %arg12[%c0_26, %c0_27] : memref<256x128xbf16, #tpu.memory_space<vmem>>, vector<256x128xbf16>
    %cst_28 = arith.constant dense<0.000000e+00> : vector<8x128xf32>
    %35 = tpu.matmul %33, %34, %cst_28 {dimension_numbers = #tpu.dot_dimension_numbers<[1], [0], [0], [1], [0, 0, 1, 1], [], []>} : vector<8x256xbf16>, vector<256x128xbf16>, vector<8x128xf32> -> vector<8x128xf32>
    %c0_29 = arith.constant 0 : index
    %c0_30 = arith.constant 0 : index
    %36 = vector.load %arg13[%c0_29, %c0_30] : memref<1x128xf32, #tpu.memory_space<vmem>>, vector<1x128xf32>
    %37 = vector.broadcast %36 : vector<1x128xf32> to vector<8x128xf32>
    %38 = arith.addf %35, %37 : vector<8x128xf32>
    %c0_31 = arith.constant 0 : index
    %c0_32 = arith.constant 0 : index
    %39 = vector.load %arg14[%c0_31, %c0_32] : memref<8x128xf32, #tpu.memory_space<vmem>>, vector<8x128xf32>
    tpu.vector_store %arg14[%c0_31, %c0_32], %38 {strides = array<i32>} : memref<8x128xf32, #tpu.memory_space<vmem>>, vector<8x128xf32>,
    return
  }
  func.func @transform_0(%arg0: i32) -> (i32, i32) {
    %c0_i32 = arith.constant 0 : i32
    %c0_i32_0 = arith.constant 0 : i32
    return %arg0, %c0_i32 : i32, i32
  }
  func.func @transform_1(%arg0: i32) -> (i32, i32) {
    %c0_i32 = arith.constant 0 : i32
    %c0_i32_0 = arith.constant 0 : i32
    return %arg0, %c0_i32 : i32, i32
  }
  func.func @transform_2(%arg0: i32) -> (i32, i32) {
    %c0_i32 = arith.constant 0 : i32
    %c0_i32_0 = arith.constant 0 : i32
    return %arg0, %c0_i32 : i32, i32
  }
  func.func @transform_3(%arg0: i32) -> (i32, i32) {
    %c0_i32 = arith.constant 0 : i32
    %c0_i32_0 = arith.constant 0 : i32
    %c0_i32_1 = arith.constant 0 : i32
    return %c0_i32, %c0_i32_0 : i32, i32
  }
  func.func @transform_4(%arg0: i32) -> (i32, i32) {
    %c0_i32 = arith.constant 0 : i32
    %c0_i32_0 = arith.constant 0 : i32
    %c0_i32_1 = arith.constant 0 : i32
    return %c0_i32, %c0_i32_0 : i32, i32
  }
  func.func @transform_5(%arg0: i32) -> (i32, i32) {
    %c0_i32 = arith.constant 0 : i32
    %c0_i32_0 = arith.constant 0 : i32
    %c0_i32_1 = arith.constant 0 : i32
    return %c0_i32, %c0_i32_0 : i32, i32
  }
  func.func @transform_6(%arg0: i32) -> (i32, i32) {
    %c0_i32 = arith.constant 0 : i32
    %c0_i32_0 = arith.constant 0 : i32
    %c0_i32_1 = arith.constant 0 : i32
    return %c0_i32, %c0_i32_0 : i32, i32
  }
  func.func @transform_7(%arg0: i32) -> (i32, i32) {
    %c0_i32 = arith.constant 0 : i32
    %c0_i32_0 = arith.constant 0 : i32
    %c0_i32_1 = arith.constant 0 : i32
    return %c0_i32, %c0_i32_0 : i32, i32
  }
  func.func @transform_8(%arg0: i32) -> (i32, i32) {
    %c0_i32 = arith.constant 0 : i32
    %c0_i32_0 = arith.constant 0 : i32
    %c0_i32_1 = arith.constant 0 : i32
    return %c0_i32, %c0_i32_0 : i32, i32
  }
  func.func @transform_9(%arg0: i32) -> (i32, i32) {
    %c0_i32 = arith.constant 0 : i32
    %c0_i32_0 = arith.constant 0 : i32
    %c0_i32_1 = arith.constant 0 : i32
    return %c0_i32, %c0_i32_0 : i32, i32
  }
  func.func @transform_10(%arg0: i32) -> (i32, i32) {
    %c0_i32 = arith.constant 0 : i32
    %c0_i32_0 = arith.constant 0 : i32
    %c0_i32_1 = arith.constant 0 : i32
    return %c0_i32, %c0_i32_0 : i32, i32
  }
  func.func @transform_11(%arg0: i32) -> (i32, i32) {
    %c0_i32 = arith.constant 0 : i32
    %c0_i32_0 = arith.constant 0 : i32
    %c0_i32_1 = arith.constant 0 : i32
    return %c0_i32, %c0_i32_0 : i32, i32
  }
  func.func @transform_12(%arg0: i32) -> (i32, i32) {
    %c0_i32 = arith.constant 0 : i32
    %c0_i32_0 = arith.constant 0 : i32
    %c0_i32_1 = arith.constant 0 : i32
    return %c0_i32, %c0_i32_0 : i32, i32
  }
  func.func @transform_13(%arg0: i32) -> (i32, i32) {
    %c0_i32 = arith.constant 0 : i32
    %c0_i32_0 = arith.constant 0 : i32
    return %arg0, %c0_i32 : i32, i32
  }
}

</mosaic_0001>

<bundles_post_ra>
// kernel: netg_forward.1
= control target key start
LH: loop header
LB: loop body
LE: loop exit
PB: predicated region body
PF: predicated region fallthrough
CT: control target
= control target key end

     0   :  { %18 = vsyncpa [#allocation3], 0  ;;  %s1592_s0 = inlined_call_operand.vmem [shape: f32[8,10], index: 0, kind: input, shape index: {}]   ;;  %s1593_s1 = inlined_call_operand.hbm [shape: f32[8,32], index: 1, kind: input, shape index: {}]   ;;  %s1594_s2 = inlined_call_operand.vmem [shape: f32[8,16], index: 2, kind: input, shape index: {}]   ;;  %s1595_s3 = inlined_call_operand.hbm [shape: bf16[10,256], index: 3, kind: input, shape index: {}]   ;;  %s1596_s4 = inlined_call_operand.vmem [shape: bf16[32,256], index: 4, kind: input, shape index: {}]   ;;  %s1597_s5 = inlined_call_operand.hbm [shape: bf16[16,256], index: 5, kind: input, shape index: {}]   ;;  %s1598_s6 = inlined_call_operand.vmem [shape: f32[1,256], index: 6, kind: input, shape index: {}]   ;;  %s1599_s7 = inlined_call_operand.hbm [shape: bf16[256,256], index: 7, kind: input, shape index: {}]   ;;  %s1600_s8 = inlined_call_operand.vmem [shape: f32[1,256], index: 8, kind: input, shape index: {}]   ;;  %s1601_s9 = inlined_call_operand.hbm [shape: bf16[256,256], index: 9, kind: input, shape index: {}]   ;;  %s1602_s10 = inlined_call_operand.vmem [shape: f32[1,256], index: 10, kind: input, shape index: {}]   ;;  %s1603_s11 = inlined_call_operand.hbm [shape: bf16[256,128], index: 11, kind: input, shape index: {}]   ;;  %s1604_s12 = inlined_call_operand.vmem [shape: f32[1,128], index: 12, kind: input, shape index: {}]   ;;  %s1605_s13 = inlined_call_operand.hbm [shape: f32[8,128], index: 13, kind: output, shape index: {}]  }
   0x1   :  { %19 = vsyncpa [#allocation6], 0 }
   0x2   :  { %20 = vsyncpa [#allocation9], 0 }
   0x3   :  { %21 = vsyncpa [#allocation12], 0 }
   0x4   :  { %22 = vsyncpa [#allocation4], 0  ;;  %s1437_s25 = smov [#allocation5]  }
   0x5   :  { %s42_s26 = sshll.u32 %s1437_s25, 4  ;;  %s43_s26 = int_to_ptr.vmem [resolvable:$true] %s42_s26 }
   0x6   :  { %s1295_s27 = scalar_lea.vmem %s43_s26, 256  ;;  %p1300_p1 = scmp.lt.s32.totalorder %s43_s26, %s43_s26 }
   0x7   :  { %p1296_p0 = scmp.ne.s32.totalorder %s43_s26, %s1295_s27  ;;  %p1301_p2 = scmp.lt.s32.totalorder %s1295_s27, %s1295_s27 }
   0x9   :  { %p1302_p3 = por %p1301_p2, %p1300_p1 }
   0xb   :  { %p1303_p4 = pnand %p1302_p3, %p1296_p0 }
   0xd   :  { %1306 = shalt.err (!%p1303_p4)
}
   0xe   :  { %s1438_s28 = smov 128   ;;  %s1439_s29 = smov 8  }
   0xf   :  { %48 = dma.hbm_to_vmem [thread:$0]  %s1595_s3, 256, %s43_s26, [#allocation6], %s1438_s28, %s1438_s28, %s1439_s29  }
  0x10   :  { %s1440_s15 = smov [#allocation8]   ;;  %s1441_s17 = smov [#allocation2]  }
  0x11   :  { %s70_s16 = sshll.u32 %s1440_s15, 4  ;;  %s31_s18 = sshll.u32 %s1441_s17, 4  ;;  %s71_s16 = int_to_ptr.vmem [resolvable:$true] %s70_s16  ;;  %s32_s18 = int_to_ptr.vmem [resolvable:$true] %s31_s18 }
  0x12   :  { %s1315_s19 = scalar_lea.vmem %s71_s16, 4096  ;;  %p1320_p6 = scmp.lt.s32.totalorder %s71_s16, %s71_s16 }
  0x13   :  { %p1316_p5 = scmp.ne.s32.totalorder %s71_s16, %s1315_s19  ;;  %p1321_p7 = scmp.lt.s32.totalorder %s1315_s19, %s1315_s19 }
  0x15   :  { %p1322_p8 = por %p1321_p7, %p1320_p6 }
  0x17   :  { %p1323_p9 = pnand %p1322_p8, %p1316_p5 }
  0x19   :  { %1326 = shalt.err (!%p1323_p9)
}
  0x1a   :  { %76 = dma.hbm_to_vmem [thread:$0]  %s1599_s7, 4096, %s71_s16, [#allocation9], %s1438_s28, %s1438_s28, %s1439_s29  }
  0x1b   :  { %s1335_s3 = scalar_lea.vmem %s32_s18, 128  ;;  %p1340_p11 = scmp.lt.s32.totalorder %s32_s18, %s32_s18 }
  0x1c   :  { %p1336_p10 = scmp.ne.s32.totalorder %s32_s18, %s1335_s3  ;;  %p1341_p12 = scmp.lt.s32.totalorder %s1335_s3, %s1335_s3 }
  0x1e   :  { %p1342_p13 = por %p1341_p12, %p1340_p11 }
  0x20   :  { %p1343_p0 = pnand %p1342_p13, %p1336_p10 }
  0x22   :  { %1346 = shalt.err (!%p1343_p0)
}
  0x23   :  { %34 = dma.hbm_to_vmem [thread:$0]  %s1593_s1, 128, %s32_s18, [#allocation3]  }
  0x24   :  { %s1442_s24 = smov [#allocation7]   ;;  %s1443_s26 = smov [#allocation10]  }
  0x25   :  { %s56_s25 = sshll.u32 %s1442_s24, 4  ;;  %s84_s27 = sshll.u32 %s1443_s26, 4  ;;  %s57_s25 = int_to_ptr.vmem [resolvable:$true] %s56_s25  ;;  %s85_s27 = int_to_ptr.vmem [resolvable:$true] %s84_s27 }
  0x26   :  { %s1355_s30 = scalar_lea.vmem %s57_s25, 256  ;;  %p1360_p2 = scmp.lt.s32.totalorder %s57_s25, %s57_s25 }
  0x27   :  { %p1356_p1 = scmp.ne.s32.totalorder %s57_s25, %s1355_s30  ;;  %p1361_p3 = scmp.lt.s32.totalorder %s1355_s30, %s1355_s30 }
  0x29   :  { %p1362_p4 = por %p1361_p3, %p1360_p2 }
  0x2b   :  { %p1363_p5 = pnand %p1362_p4, %p1356_p1 }
  0x2d   :  { %1366 = shalt.err (!%p1363_p5)
}
  0x2e   :  { %62 = dma.hbm_to_vmem [thread:$0]  %s1597_s5, 256, %s57_s25, [#allocation6], %s1438_s28, %s1438_s28, %s1439_s29  }
  0x2f   :  { %s1375_s1 = scalar_lea.vmem %s85_s27, 4096  ;;  %p1380_p7 = scmp.lt.s32.totalorder %s85_s27, %s85_s27 }
  0x30   :  { %p1376_p6 = scmp.ne.s32.totalorder %s85_s27, %s1375_s1  ;;  %p1381_p8 = scmp.lt.s32.totalorder %s1375_s1, %s1375_s1 }
  0x32   :  { %p1382_p9 = por %p1381_p8, %p1380_p7 }
  0x34   :  { %p1383_p10 = pnand %p1382_p9, %p1376_p6 }
  0x36   :  { %1386 = shalt.err (!%p1383_p10)
}
  0x37   :  { %90 = dma.hbm_to_vmem [thread:$0]  %s1601_s9, 4096, %s85_s27, [#allocation9], %s1438_s28, %s1438_s28, %s1439_s29  }
  0x38   :  { %s1444_s17 = smov [#allocation11]  }
  0x39   :  { %s98_s18 = sshll.u32 %s1444_s17, 4  ;;  %s99_s18 = int_to_ptr.vmem [resolvable:$true] %s98_s18 }
  0x3a   :  { %s1395_s19 = scalar_lea.vmem %s99_s18, 2048  ;;  %p1400_p12 = scmp.lt.s32.totalorder %s99_s18, %s99_s18 }
  0x3b   :  { %p1396_p11 = scmp.ne.s32.totalorder %s99_s18, %s1395_s19  ;;  %p1401_p13 = scmp.lt.s32.totalorder %s1395_s19, %s1395_s19 }
  0x3d   :  { %p1402_p0 = por %p1401_p13, %p1400_p12 }
  0x3f   :  { %p1403_p1 = pnand %p1402_p0, %p1396_p11 }
  0x41   :  { %1406 = shalt.err (!%p1403_p1)
}
  0x42   :  { %s1445_s5 = smov 64   ;;  %s1446_s20 = smov 4  }
  0x43   :  { %104 = dma.hbm_to_vmem [thread:$0]  %s1603_s11, 2048, %s99_s18, [#allocation12], %s1445_s5, %s1445_s5, %s1446_s20  }
  0x44   :  { %1427 = dma.done.wait [#allocation3], 128  }
  0x45   :  { %1428 = vsyncadd [#allocation3], 4294967168 }
  0x46   :  { %1429 = dma.done.wait [#allocation6], 512  }
  0x47   :  { %1430 = vsyncadd [#allocation6], 4294966784 }
  0x48   :  { %1431 = dma.done.wait [#allocation9], 8192  }
  0x49   :  { %1432 = vsyncadd [#allocation9], 4294959104 }
  0x4a   :  { %1433 = dma.done.wait [#allocation12], 2048  }
  0x4b   :  { %1434 = vsyncadd [#allocation12], 4294965248  ;;  %v1447_v0 = vmov 0   ;;  %v1159_v1 = vld [vmem:[%s1596_s4 + $0x14] ss:$8 sps:$4 sm:$0xff]   ;;  %v130_v5 = vld [vmem:[#allocation2] sm:$0xff] }
  0x4c   :  { %192 = vmatprep.mubr.bf16.mxu1 %v1447_v0  ;;  %v1161_v2 = vld [vmem:[%s1596_s4 + $0x10] ss:$8 sps:$4 sm:$0xff]   ;;  %172 = vmatprep.subr.bf16.mxu1 %v1159_v1  ;;  %v1162_v3 = vld [vmem:[%s1596_s4 + $0x4] ss:$8 sps:$4 sm:$0xff]   ;;  %v1164_v4 = vld [vmem:[%s1596_s4] ss:$8 sps:$4 sm:$0xff]   ;;  %v131_v8 = vpack.c.bf16 %v130_v5, %v130_v5 }
  0x4d   :  { %173 = vmatpush1.bf16.msra.mxu1 %v1161_v2  ;;  %v1165_v6 = vld [vmem:[#allocation5 + $0x4] ss:$8 sps:$4 sm:$0x1f]   ;;  %v1167_v7 = vld [vmem:[#allocation5] ss:$8 sps:$4 sm:$0x1f]  }
  0x4e   :  { %174 = vmatprep.subr.bf16.mxu1 %v1162_v3  ;;  %vm213_vm0 = vcmask 1044480   ;;  %vm156_vm1 = vcmask 261120   ;;  %v1171_v9 = vld [vmem:[#allocation8 + $0x74] ss:$8 sps:$4 sm:$0xff]   ;;  %v1173_v10 = vld [vmem:[#allocation8 + $0x70] ss:$8 sps:$4 sm:$0xff]  }
  0x4f   :  { %v215_v11 = vsel %vm213_vm0, %v1167_v7, 0  ;;  %v1170_v12 = vld [vmem:[#allocation7 + $0x4] ss:$8 sps:$4 sm:$0xff]   ;;  %v1174_v13 = vld [vmem:[#allocation8 + $0x64] ss:$8 sps:$4 sm:$0xff]   ;;  %544 = vmatprep.subr.bf16.mxu0 %v1171_v9  ;;  %vm209_vm2 = vcmask 80896  }
  0x50   :  { %545 = vmatpush1.bf16.msra.mxu0 %v1173_v10  ;;  %v1176_v14 = vld [vmem:[#allocation8 + $0x60] ss:$8 sps:$4 sm:$0xff]   ;;  %v126_v15 = vld [vmem:[%s1592_s0] sm:$0xff]  ;;  %v1180_v20 = vld [vmem:[#allocation8 + $0x44] ss:$8 sps:$4 sm:$0xff]   ;;  %vm275_vm3 = vcmask 130048  }
  0x51   :  { %175 = vmatpush1.bf16.msra.mxu1 %v1164_v4  ;;  %v1177_v16 = vld [vmem:[#allocation8 + $0x54] ss:$8 sps:$4 sm:$0xff]   ;;  %546 = vmatprep.subr.bf16.mxu0 %v1174_v13  ;;  %v1168_v17 = vld [vmem:[#allocation7] ss:$8 sps:$4 sm:$0xff]   ;;  %v127_v19 = vpack.c.bf16 %v126_v15, %v126_v15  ;;  %v1182_v21 = vld [vmem:[#allocation8 + $0x40] ss:$8 sps:$4 sm:$0xff]  }
  0x52   :  { %1039 = vmatprep.subr.msk.bf16.mxu1 %vm213_vm0, %v1165_v6  ;;  %v1179_v18 = vld [vmem:[#allocation8 + $0x50] ss:$8 sps:$4 sm:$0xff]   ;;  %v1183_v23 = vld [vmem:[#allocation8 + $0x34] ss:$8 sps:$4 sm:$0xff]   ;;  %v1186_v25 = vld [vmem:[#allocation8 + $0x24] ss:$8 sps:$4 sm:$0xff]  }
  0x53   :  { %v261_v22 = vld [vmem:[%s1594_s2] sm:$0xff]  ;;  %v1188_v27 = vld [vmem:[#allocation8 + $0x20] ss:$8 sps:$4 sm:$0xff]   ;;  %v1192_v30 = vld [vmem:[#allocation8 + $0x4] ss:$8 sps:$4 sm:$0xff]  }
  0x54   :  { %1036 = vmatmul.mubr.msk.bf16.vlgmr.msra.gmra.mxu1 %vm156_vm1, %v131_v8  ;;  %547 = vmatpush1.bf16.msra.mxu0 %v1176_v14  ;;  %v1185_v24 = vld [vmem:[#allocation8 + $0x30] ss:$8 sps:$4 sm:$0xff]   ;;  %v262_v26 = vpack.c.bf16 %v261_v22, %v261_v22  ;;  %v1189_v28 = vld [vmem:[#allocation8 + $0x14] ss:$8 sps:$4 sm:$0xff]   ;;  %v1194_v31 = vld [vmem:[#allocation8] ss:$8 sps:$4 sm:$0xff]  }
  0x55   :  { %235 = vmatpush1.bf16.msra.mxu1 %v215_v11  ;;  %252 = vmatprep.mubr.bf16.mxu1 %v1447_v0  ;;  %v1191_v29 = vld [vmem:[#allocation8 + $0x10] ss:$8 sps:$4 sm:$0xff]   ;;  %v1195_v32 = vld [vmem:[#allocation8 + $0xf4] ss:$8 sps:$4 sm:$0xff]   ;;  %v1198_v34 = vld [vmem:[#allocation8 + $0xe4] ss:$8 sps:$4 sm:$0xff]  }
  0x56   :  { %293 = vmatprep.subr.bf16.mxu1 %v1170_v12  ;;  %548 = vmatprep.subr.bf16.mxu0 %v1177_v16  ;;  %v1197_v33 = vld [vmem:[#allocation8 + $0xf0] ss:$8 sps:$4 sm:$0xff]   ;;  %v1200_v35 = vld [vmem:[#allocation8 + $0xe0] ss:$8 sps:$4 sm:$0xff]   ;;  %v1201_v36 = vld [vmem:[#allocation8 + $0xd4] ss:$8 sps:$4 sm:$0xff]   ;;  %v324_v12 = vlaneseq }
  0x57   :  { %v1203_v37 = vld [vmem:[#allocation8 + $0xd0] ss:$8 sps:$4 sm:$0xff]   ;;  %v1204_v38 = vld [vmem:[#allocation8 + $0xc4] ss:$8 sps:$4 sm:$0xff]   ;;  %v1206_v39 = vld [vmem:[#allocation8 + $0xc0] ss:$8 sps:$4 sm:$0xff]  }
  0x58   :  { %549 = vmatpush1.bf16.msra.mxu0 %v1179_v18  ;;  %v1207_v40 = vld [vmem:[#allocation8 + $0xb4] ss:$8 sps:$4 sm:$0xff]   ;;  %v1209_v41 = vld [vmem:[#allocation8 + $0xb0] ss:$8 sps:$4 sm:$0xff]   ;;  %v1210_v42 = vld [vmem:[#allocation8 + $0xa4] ss:$8 sps:$4 sm:$0xff]  }
  0x59   :  { %550 = vmatprep.subr.bf16.mxu0 %v1180_v20  ;;  %v1212_v43 = vld [vmem:[#allocation8 + $0xa0] ss:$8 sps:$4 sm:$0xff]   ;;  %v1213_v44 = vld [vmem:[#allocation8 + $0x94] ss:$8 sps:$4 sm:$0xff]   ;;  %v1215_v45 = vld [vmem:[#allocation8 + $0x90] ss:$8 sps:$4 sm:$0xff]  }
  0x5a   :  { %v1216_v46 = vld [vmem:[#allocation8 + $0x84] ss:$8 sps:$4 sm:$0xff]   ;;  %v1218_v47 = vld [vmem:[#allocation8 + $0x80] ss:$8 sps:$4 sm:$0xff]   ;;  %v1219_v48 = vld [vmem:[#allocation10 + $0x70] ss:$8 sps:$4 sm:$0xff]  }
  0x5b   :  { %v1221_v49 = vld [vmem:[#allocation10 + $0x74] ss:$8 sps:$4 sm:$0xff]   ;;  %v1224_v50 = vld [vmem:[#allocation10 + $0x64] ss:$8 sps:$4 sm:$0xff]   ;;  %v1222_v51 = vld [vmem:[#allocation10 + $0x60] ss:$8 sps:$4 sm:$0xff]  }
  0x5c   :  { %1040 = vmatmul.mubr.msk.bf16.vlgmr.msra.gmra.mxu1 %vm209_vm2, %v127_v19  ;;  %551 = vmatpush1.bf16.msra.mxu0 %v1182_v21  ;;  %v1227_v52 = vld [vmem:[#allocation10 + $0x54] ss:$8 sps:$4 sm:$0xff]   ;;  %v1225_v53 = vld [vmem:[#allocation10 + $0x50] ss:$8 sps:$4 sm:$0xff]   ;;  %v1230_v54 = vld [vmem:[#allocation10 + $0x44] ss:$8 sps:$4 sm:$0xff]  }
  0x5d   :  { %294 = vmatpush1.bf16.msra.mxu1 %v1168_v17  ;;  %311 = vmatprep.mubr.bf16.mxu1 %v1447_v0  ;;  %v1228_v55 = vld [vmem:[#allocation10 + $0x40] ss:$8 sps:$4 sm:$0xff]   ;;  %v1233_v56 = vld [vmem:[#allocation10 + $0x34] ss:$8 sps:$4 sm:$0xff]   ;;  %v1231_v57 = vld [vmem:[#allocation10 + $0x30] ss:$8 sps:$4 sm:$0xff]  }
  0x5e   :  { %552 = vmatprep.subr.bf16.mxu0 %v1183_v23  ;;  %795 = vmatprep.subr.bf16.mxu1 %v1221_v49  ;;  %v1236_v58 = vld [vmem:[#allocation10 + $0x24] ss:$8 sps:$4 sm:$0xff]   ;;  %v1234_v59 = vld [vmem:[#allocation10 + $0x20] ss:$8 sps:$4 sm:$0xff]   ;;  %v1239_v60 = vld [vmem:[#allocation10 + $0x14] ss:$8 sps:$4 sm:$0xff]  }
  0x5f   :  { %v1237_v61 = vld [vmem:[#allocation10 + $0x10] ss:$8 sps:$4 sm:$0xff]   ;;  %v1242_v62 = vld [vmem:[#allocation10 + $0x4] ss:$8 sps:$4 sm:$0xff]   ;;  %v1240_v63 = vld [vmem:[#allocation10] ss:$8 sps:$4 sm:$0xff]  }
  0x60   :  { %553 = vmatpush1.bf16.msra.mxu0 %v1185_v24  ;;  %v1245_v0 = vld [vmem:[#allocation10 + $0xf4] ss:$8 sps:$4 sm:$0xff]   ;;  %v1243_v1 = vld [vmem:[#allocation10 + $0xf0] ss:$8 sps:$4 sm:$0xff]   ;;  %v1248_v2 = vld [vmem:[#allocation10 + $0xe4] ss:$8 sps:$4 sm:$0xff]  }
  0x61   :  { %554 = vmatprep.subr.bf16.mxu0 %v1186_v25  ;;  %v1246_v3 = vld [vmem:[#allocation10 + $0xe0] ss:$8 sps:$4 sm:$0xff]   ;;  %v1251_v4 = vld [vmem:[#allocation10 + $0xd4] ss:$8 sps:$4 sm:$0xff]   ;;  %v1249_v5 = vld [vmem:[#allocation10 + $0xd0] ss:$8 sps:$4 sm:$0xff]  }
  0x62   :  { %v1254_v6 = vld [vmem:[#allocation10 + $0xc4] ss:$8 sps:$4 sm:$0xff]   ;;  %v1252_v7 = vld [vmem:[#allocation10 + $0xc0] ss:$8 sps:$4 sm:$0xff]   ;;  %v1257_v8 = vld [vmem:[#allocation10 + $0xb4] ss:$8 sps:$4 sm:$0xff]  }
  0x63   :  { %v1255_v9 = vld [vmem:[#allocation10 + $0xb0] ss:$8 sps:$4 sm:$0xff]   ;;  %v325_v15 = vshrl.u32 %v324_v12, 7  ;;  %v1271_v49 = vld [vmem:[#allocation11 + $0x68] sm:$0xff]  }
  0x64   :  { %1043 = vmatmul.mubr.msk.bf16.vlgmr.msra.gmra.mxu1 %vm275_vm3, %v262_v26  ;;  %555 = vmatpush1.bf16.msra.mxu0 %v1188_v27  ;;  %v322_v20 = vld [vmem:[%s1598_s6] sm:$0x3] }
  0x65   :  { %556 = vmatprep.subr.bf16.mxu0 %v1189_v28  ;;  %796 = vmatpush1.bf16.msra.mxu1 %v1219_v48  ;;  %v1567_v18 = vsub.s32 0, %v325_v15  ;;  %v1572_v21 = vsub.s32 1, %v325_v15  ;;  %v1270_v48 = vld [vmem:[#allocation11 + $0x30] sm:$0xff]   ;;  %v623_v12 = vld [vmem:[%s1602_s10] sm:$0x3]  ;;  %s1448_s10 = smov [#allocation13]  }
  0x66   :  { %797 = vmatprep.subr.bf16.mxu1 %v1224_v50  ;;  %v1272_v50 = vld [vmem:[#allocation11 + $0x28] sm:$0xff]   ;;  %s1020_s16 = sshll.u32 %s1448_s10, 4  ;;  %s1021_s16 = int_to_ptr.vmem [resolvable:$true] %s1020_s16 }
  0x67   :  { %v327_v24 = vrot.slane %v322_v20, %v1567_v18  ;;  %v331_v28 = vrot.slane %v322_v20, %v1572_v21  ;;  %s1407_s17 = scalar_lea.vmem %s1021_s16, 128  ;;  %p1412_p3 = scmp.lt.s32.totalorder %s1021_s16, %s1021_s16 }
  0x68   :  { %557 = vmatpush1.bf16.msra.mxu0 %v1191_v29  ;;  %p1408_p2 = scmp.ne.s32.totalorder %s1021_s16, %s1407_s17  ;;  %p1413_p4 = scmp.lt.s32.totalorder %s1407_s17, %s1407_s17 }
  0x69   :  { %558 = vmatprep.subr.bf16.mxu0 %v1192_v30  ;;  %798 = vmatpush1.bf16.msra.mxu1 %v1222_v51  ;;  %v1273_v51 = vld [vmem:[#allocation11 + $0x60] sm:$0xff]  }
  0x6a   :  { %799 = vmatprep.subr.bf16.mxu1 %v1227_v52  ;;  %v1274_v52 = vld [vmem:[#allocation11 + $0x20] sm:$0xff]   ;;  %p1414_p5 = por %p1413_p4, %p1412_p3 }
  0x6c   :  { %559 = vmatpush1.bf16.msra.mxu0 %v1194_v31  ;;  %p1415_p6 = pnand %p1414_p5, %p1408_p2 }
  0x6d   :  { %560 = vmatprep.subr.bf16.mxu0 %v1195_v32  ;;  %800 = vmatpush1.bf16.msra.mxu1 %v1225_v53  ;;  %v1275_v53 = vld [vmem:[#allocation11 + $0x58] sm:$0xff]  }
  0x6e   :  { %801 = vmatprep.subr.bf16.mxu1 %v1230_v54  ;;  %v1276_v54 = vld [vmem:[#allocation11 + $0x18] sm:$0xff]  }
  0x70   :  { %561 = vmatpush2.bf16.msra.mxu0 %v1197_v33 }
  0x71   :  { %562 = vmatprep.subr.bf16.mxu0 %v1198_v34  ;;  %802 = vmatpush1.bf16.msra.mxu1 %v1228_v55  ;;  %v1277_v55 = vld [vmem:[#allocation11 + $0x50] sm:$0xff]  }
  0x72   :  { %803 = vmatprep.subr.bf16.mxu1 %v1233_v56  ;;  %v1278_v56 = vld [vmem:[#allocation11 + $0x10] sm:$0xff]  }
  0x74   :  { %563 = vmatpush2.bf16.msra.mxu0 %v1200_v35 }
  0x75   :  { %564 = vmatprep.subr.bf16.mxu0 %v1201_v36  ;;  %804 = vmatpush1.bf16.msra.mxu1 %v1231_v57  ;;  %v372_v57 = vld [vmem:[%s1600_s8] sm:$0x3] }
  0x76   :  { %805 = vmatprep.subr.bf16.mxu1 %v1236_v58  ;;  %v377_v58 = vrot.slane %v372_v57, %v1567_v18 }
  0x78   :  { %565 = vmatpush2.bf16.msra.mxu0 %v1203_v37 }
  0x79   :  { %566 = vmatprep.subr.bf16.mxu0 %v1204_v38  ;;  %806 = vmatpush1.bf16.msra.mxu1 %v1234_v59  ;;  %v381_v59 = vrot.slane %v372_v57, %v1572_v21 }
  0x7a   :  { %807 = vmatprep.subr.bf16.mxu1 %v1239_v60 }
  0x7c   :  { %567 = vmatpush2.bf16.msra.mxu0 %v1206_v39  ;;  %v1260_v39 = vld [vmem:[#allocation10 + $0xa4] ss:$8 sps:$4 sm:$0xff]  }
  0x7d   :  { %568 = vmatprep.subr.bf16.mxu0 %v1207_v40  ;;  %808 = vmatpush1.bf16.msra.mxu1 %v1237_v61  ;;  %v1258_v40 = vld [vmem:[#allocation10 + $0xa0] ss:$8 sps:$4 sm:$0xff]  }
  0x7e   :  { %809 = vmatprep.subr.bf16.mxu1 %v1242_v62 }
  0x80   :  { %569 = vmatpush2.bf16.msra.mxu0 %v1209_v41  ;;  %v1263_v41 = vld [vmem:[#allocation10 + $0x94] ss:$8 sps:$4 sm:$0xff]  }
  0x81   :  { %570 = vmatprep.subr.bf16.mxu0 %v1210_v42  ;;  %810 = vmatpush1.bf16.msra.mxu1 %v1240_v63  ;;  %v1261_v42 = vld [vmem:[#allocation10 + $0x90] ss:$8 sps:$4 sm:$0xff]  }
  0x82   :  { %811 = vmatprep.subr.bf16.mxu1 %v1245_v0 }
  0x84   :  { %571 = vmatpush2.bf16.msra.mxu0 %v1212_v43  ;;  %v1266_v43 = vld [vmem:[#allocation10 + $0x84] ss:$8 sps:$4 sm:$0xff]  }
  0x85   :  { %572 = vmatprep.subr.bf16.mxu0 %v1213_v44  ;;  %812 = vmatpush2.bf16.msra.mxu1 %v1243_v1  ;;  %v1264_v44 = vld [vmem:[#allocation10 + $0x80] ss:$8 sps:$4 sm:$0xff]  }
  0x86   :  { %813 = vmatprep.subr.bf16.mxu1 %v1248_v2 }
  0x88   :  { %573 = vmatpush2.bf16.msra.mxu0 %v1215_v45  ;;  %v1267_v45 = vld [vmem:[#allocation11 + $0x78] sm:$0xff]  }
  0x89   :  { %574 = vmatprep.subr.bf16.mxu0 %v1216_v46  ;;  %814 = vmatpush2.bf16.msra.mxu1 %v1246_v3  ;;  %v1268_v46 = vld [vmem:[#allocation11 + $0x38] sm:$0xff]  }
  0x8a   :  { %815 = vmatprep.subr.bf16.mxu1 %v1251_v4 }
  0x8c   :  { %575 = vmatpush2.bf16.msra.mxu0 %v1218_v47  ;;  %v1269_v47 = vld [vmem:[#allocation11 + $0x70] sm:$0xff]  }
  0x8d   :  { %816 = vmatpush2.bf16.msra.mxu1 %v1249_v5  ;;  %1125 = vmatprep.subr.bf16.mxu0 %v1267_v45 }
  0x8e   :  { %817 = vmatprep.subr.bf16.mxu1 %v1254_v6 }
  0x91   :  { %818 = vmatpush2.bf16.msra.mxu1 %v1252_v7 }
  0x92   :  { %819 = vmatprep.subr.bf16.mxu1 %v1257_v8  ;;  %v1279_v8 = vld [vmem:[#allocation11 + $0x48] sm:$0xff]  }
  0x95   :  { %820 = vmatpush2.bf16.msra.mxu1 %v1255_v9  ;;  %v1280_v9 = vld [vmem:[#allocation11 + $0x8] sm:$0xff]  }
  0x96   :  { %821 = vmatprep.subr.bf16.mxu1 %v1260_v39 }
  0x99   :  { %822 = vmatpush2.bf16.msra.mxu1 %v1258_v40 }
  0x9a   :  { %823 = vmatprep.subr.bf16.mxu1 %v1263_v41 }
  0x9d   :  { %824 = vmatpush2.bf16.msra.mxu1 %v1261_v42 }
  0x9e   :  { %825 = vmatprep.subr.bf16.mxu1 %v1266_v43 }
  0xa1   :  { %826 = vmatpush2.bf16.msra.mxu1 %v1264_v44 }
 0x114   :  { %v194_v10 = vpop.f32.mrf.mxu1 }
 0x116   :  { %v196_v11 = vpop.f32.mrf.mxu1 }
 0x118   :  { %v198_v13 = vpop.f32.mrf.mxu1 }
 0x119   :  { %v628_v13 = vrot.slane %v623_v12, %v1567_v18 }
 0x11a   :  { %v199_v14 = vpop.f32.mrf.mxu1 }
 0x11b   :  { %v632_v14 = vrot.slane %v623_v12, %v1572_v21 }
 0x11c   :  { %v254_v16 = vpop.f32.mrf.mxu1 }
 0x11d   :  { %v255_v23 = vadd.f32 %v254_v16, %v194_v10  ;;  %v1281_v10 = vld [vmem:[#allocation11 + $0x40] sm:$0xff]  }
 0x11e   :  { %v256_v17 = vpop.f32.mrf.mxu1 }
 0x11f   :  { %v257_v26 = vadd.f32 %v256_v17, %v196_v11  ;;  %v1282_v11 = vld [vmem:[#allocation11] sm:$0xff]  }
 0x120   :  { %v258_v19 = vpop.f32.mrf.mxu1 }
 0x122   :  { %v259_v22 = vpop.f32.mrf.mxu1 }
 0x124   :  { %v313_v25 = vpop.f32.mrf.mxu1 }
 0x125   :  { %v320_v27 = vadd.f32 %v313_v25, %v255_v23 }
 0x126   :  { %v315_v29 = vpop.f32.mrf.mxu1 }
 0x127   :  { %v334_v30 = vadd.f32 %v327_v24, %v320_v27  ;;  %v321_v31 = vadd.f32 %v315_v29, %v257_v26  ;;  %v1108_v26 = vld [vmem:[%s1604_s12] ss:$0 sm:$0xff] }
 0x128   :  { %v317_v32 = vpop.f32.mrf.mxu1 }
 0x129   :  { %v335_v33 = vadd.f32 %v331_v28, %v321_v31  ;;  %1283 = vtanh.f32 %v334_v30 }
 0x12a   :  { %v318_v34 = vpop.f32.mrf.mxu1 }
 0x12b   :  { %1285 = vtanh.f32 %v335_v33 }
 0x136   :  { %v1284_v35 = vpop.eup %1283 }
 0x137   :  { %v338_v38 = vpack.c.bf16 %v1284_v35, %v1284_v35 }
 0x138   :  { %v1286_v36 = vpop.eup %1285 }
 0x139   :  { %v339_v37 = vpack.c.bf16 %v1286_v36, %v1286_v36 }
 0x13b   :  { %576 = vmatprep.mubr.bf16.mxu0 %v339_v37 }
 0x13c   :  { %577 = vmatmul.mubr.bf16.vlgmr.msra.gmra.mxu0 %v338_v38 }
 0x13d   :  { %1126 = vmatpush3.bf16.msra.mxu0 %v1268_v46 }
 0x13e   :  { %1127 = vmatprep.subr.bf16.mxu0 %v1269_v47 }
 0x141   :  { %1128 = vmatpush3.bf16.msra.mxu0 %v1270_v48 }
 0x142   :  { %1129 = vmatprep.subr.bf16.mxu0 %v1271_v49 }
 0x145   :  { %1130 = vmatpush3.bf16.msra.mxu0 %v1272_v50 }
 0x146   :  { %1131 = vmatprep.subr.bf16.mxu0 %v1273_v51 }
 0x149   :  { %1132 = vmatpush3.bf16.msra.mxu0 %v1274_v52 }
 0x14a   :  { %1133 = vmatprep.subr.bf16.mxu0 %v1275_v53 }
 0x14d   :  { %1134 = vmatpush3.bf16.msra.mxu0 %v1276_v54 }
 0x14e   :  { %1135 = vmatprep.subr.bf16.mxu0 %v1277_v55 }
 0x151   :  { %1136 = vmatpush3.bf16.msra.mxu0 %v1278_v56 }
 0x152   :  { %1137 = vmatprep.subr.bf16.mxu0 %v1279_v8 }
 0x155   :  { %1138 = vmatpush3.bf16.msra.mxu0 %v1280_v9 }
 0x156   :  { %1139 = vmatprep.subr.bf16.mxu0 %v1281_v10 }
 0x159   :  { %1140 = vmatpush3.bf16.msra.mxu0 %v1282_v11 }
 0x1fc   :  { %v578_v60 = vpop.f32.mrf.mxu0 }
 0x1fd   :  { %v579_v61 = vadd.f32 %v578_v60, %v377_v58 }
 0x1fe   :  { %v580_v62 = vpop.f32.mrf.mxu0 }
 0x1ff   :  { %v585_v63 = vmul.f32 0.2, %v579_v61  ;;  %v581_v0 = vadd.f32 %v580_v62, %v381_v59 }
 0x200   :  { %v582_v1 = vpop.f32.mrf.mxu0 }
 0x201   :  { %v586_v2 = vmul.f32 0.2, %v581_v0  ;;  %v587_v3 = vmax.f32 %v579_v61, %v585_v63 }
 0x202   :  { %v583_v4 = vpop.f32.mrf.mxu0 }
 0x203   :  { %v588_v5 = vmax.f32 %v581_v0, %v586_v2  ;;  %v589_v7 = vpack.c.bf16 %v587_v3, %v587_v3 }
 0x205   :  { %v590_v6 = vpack.c.bf16 %v588_v5, %v588_v5 }
 0x207   :  { %827 = vmatprep.mubr.bf16.mxu1 %v590_v6 }
 0x208   :  { %828 = vmatmul.mubr.bf16.vlgmr.msra.gmra.mxu1 %v589_v7 }
 0x2c8   :  { %v829_v15 = vpop.f32.mrf.mxu1 }
 0x2c9   :  { %v830_v16 = vadd.f32 %v829_v15, %v628_v13 }
 0x2ca   :  { %v831_v17 = vpop.f32.mrf.mxu1 }
 0x2cb   :  { %v832_v19 = vadd.f32 %v831_v17, %v632_v14  ;;  %v836_v23 = vpack.c.bf16 %v830_v16, %v830_v16 }
 0x2cc   :  { %v833_v20 = vpop.f32.mrf.mxu1 }
 0x2cd   :  { %v837_v22 = vpack.c.bf16 %v832_v19, %v832_v19 }
 0x2ce   :  { %v834_v24 = vpop.f32.mrf.mxu1 }
 0x2cf   :  { %1005 = vmatprep.mubr.bf16.mxu0 %v837_v22 }
 0x2d0   :  { %1006 = vmatmul.mubr.bf16.vlgmr.msra.gmra.mxu0 %v836_v23 }
 0x390   :  { %v1141_v25 = vpop.f32.mrf.mxu0 }
 0x392   :  { %v1142_v27 = vpop.f32.mrf.mxu0 }
 0x393   :  { %v1143_v18 = vadd.f32 %v1142_v27, %v1141_v25 }
 0x394   :  { %v1144_v21 = vpop.f32.mrf.mxu0 }
 0x395   :  { %v1008_v28 = vadd.f32 %v1143_v18, %v1108_v26 }
 0x396   :  { %v1145_v29 = vpop.f32.mrf.mxu0 }
 0x397   :  { %1013 = vst [vmem:[#allocation13] sm:$0xff] %v1008_v28 }
 0x398   :  { %1418 = shalt.err (!%p1415_p6)
}
 0x399   :  { %1023 = dma.vmem_to_hbm [thread:$0]  %s1021_s16, 128, %s1605_s13, [#allocation4]  }
 0x39a   :  { %1435 = dma.done.wait [#allocation4], 128  }
 0x39b   :  { %1436 = vsyncadd [#allocation4], 4294967168 }
 0x39c   :  { %1027 = vsyncpa [#allocation3], 1 }
 0x39d   :  { %1028 = vsyncpa [#allocation6], 1 }
 0x39e   :  { %1029 = vsyncpa [#allocation9], 1 }
 0x39f   :  { %1030 = vsyncpa [#allocation12], 1 }
 0x3a0   :  { %1031 = vsyncpa [#allocation4], 1 }

</bundles_post_ra>
